<compile_context>
chip_gen: v6e
topology: v6e:2x2x1
jax: 0.10.0
libtpu: 0.0.40
codegen_flags: <defaults>
</compile_context>

<pallas_src>
import functools

import jax
import jax.numpy as jnp
from jax import lax
from jax.experimental import pallas as pl
from jax.experimental.pallas import tpu as pltpu


def _layer_norm(v, gamma, beta, eps=1e-5):
    mean = jnp.mean(v, axis=-1, keepdims=True)
    var = jnp.mean((v - mean) ** 2, axis=-1, keepdims=True)  # unbiased=False
    return gamma * ((v - mean) * lax.rsqrt(var + eps)) + beta


def _gelu_tanh(x):
    return 0.5 * x * (1.0 + jnp.tanh(jnp.sqrt(2.0 / jnp.pi) * (x + 0.044715 * x ** 3)))


def transformer_block_kernel(
    x_ref,                     # (1, S, D)  current batch element
    wqkv_ref,                  # (H, D, 3*hd) per-head fused Q|K|V weight (qkv_bias=False)
    wo_ref, bo_ref,            # (H, hd, D), (1, D)   out-projection split per head
    w1_ref, b1_ref,            # (n_ff, D, tf), (n_ff, 1, tf)   FF up-proj, tiled over 4D
    w2_ref, b2_ref,            # (n_ff, tf, D), (1, D)          FF down-proj, tiled over 4D
    g1_ref, s1_ref,            # LayerNorm1 scale/shift: (1, D)
    g2_ref, s2_ref,            # LayerNorm2 scale/shift: (1, D)
    o_ref,                     # (1, S, D)
    acc_ref,                   # (S, D)  f32 scratch: attn-out accumulator, reused for FF
    acch_ref,                  # (S, hd) f32 scratch: per-head AV accumulator
    m_ref, l_ref,              # (S, 1)  f32 scratch: online-softmax running max / sum
    k_ref, v_ref,              # (S, hd) scratch (matmul dtype): current head's K / V
    *, num_heads, kv_tile, exp_dtype,
):
    S = x_ref.shape[1]
    D = x_ref.shape[2]
    hd = D // num_heads
    n_kv = S // kv_tile
    n_ff = w1_ref.shape[0]
    # Matmul operands follow the weight dtype (bf16 -> 2x MXU, half the weight DMA);
    # accumulation / LN / softmax stats / GELU stay in f32.
    mm_dtype = wqkv_ref.dtype
    neg = jnp.float32(-1e30)   # finite mask value: fully-masked tiles give exp -> 0, not NaN

    x = x_ref[0].astype(jnp.float32)                                   # (S, D)

    # ---- block 1: norm1 -> causal MHA (flash over KV tiles) -> residual ---------------
    xn = _layer_norm(x, g1_ref[0], s1_ref[0])
    xn_mm = xn.astype(mm_dtype)
    inv_sqrt_hd = jnp.float32(1.0 / (hd ** 0.5))                       # folded into Q

    row_ids = lax.broadcasted_iota(jnp.int32, (S, kv_tile), 0)         # hoisted, reused

    acc_ref[...] = jnp.zeros_like(acc_ref)

    @pl.loop(0, num_heads)
    def _head(h):
        # Fused per-head QKV projection: one (S,D)x(D,3hd) matmul, leading-axis weight index.
        qkv_h = jnp.dot(xn_mm, wqkv_ref[h], preferred_element_type=jnp.float32)  # (S, 3hd)
        q_h = (qkv_h[:, :hd] * inv_sqrt_hd).astype(mm_dtype)
        k_ref[...] = qkv_h[:, hd:2 * hd].astype(mm_dtype)
        v_ref[...] = qkv_h[:, 2 * hd:].astype(mm_dtype)

        m_ref[...] = jnp.full_like(m_ref, neg)
        l_ref[...] = jnp.zeros_like(l_ref)
        acch_ref[...] = jnp.zeros_like(acch_ref)

        @pl.loop(0, n_kv)
        def _kv(t):
            start = pl.multiple_of(t * kv_tile, kv_tile)
            k_t = k_ref[pl.ds(start, kv_tile), :]                      # (kv_tile, hd)
            v_t = v_ref[pl.ds(start, kv_tile), :]
            # q @ k^T via dot_general contracting the last dims (no explicit transpose).
            s_t = lax.dot_general(q_h, k_t, (((1,), (1,)), ((), ())),
                                  preferred_element_type=jnp.float32)  # (S, kv_tile)
            col_ids = start + lax.broadcasted_iota(jnp.int32, (S, kv_tile), 1)
            s_t = jnp.where(col_ids > row_ids, neg, s_t)               # causal mask (per tile)

            m_prev = m_ref[...]
            m_new = jnp.maximum(m_prev, jnp.max(s_t, axis=-1, keepdims=True))
            alpha = jnp.exp(m_prev - m_new)
            # softmax exp optionally in bf16 (v6e/v7x EUP); stats stay f32.
            p = jnp.exp((s_t - m_new).astype(exp_dtype)).astype(jnp.float32)
            l_ref[...] = alpha * l_ref[...] + jnp.sum(p, axis=-1, keepdims=True)
            acch_ref[...] = alpha * acch_ref[...] + jnp.dot(
                p.astype(mm_dtype), v_t, preferred_element_type=jnp.float32)
            m_ref[...] = m_new

        # Deferred softmax normalization: scale the (S, hd) AV result, not (S, S) probs.
        ctx_h = acch_ref[...] * pl.reciprocal(l_ref[...], approx=True)
        # Fuse this head's slice of the output projection (accumulate -> lane-dense (S, D)).
        acc_ref[...] += jnp.dot(ctx_h.astype(mm_dtype), wo_ref[h],
                                preferred_element_type=jnp.float32)

    x1 = acc_ref[...] + bo_ref[0] + x                                  # residual 1

    # ---- block 2: norm2 -> feed-forward (tiled over the 4*D hidden dim) -> residual ----
    xn2_mm = _layer_norm(x1, g2_ref[0], s2_ref[0]).astype(mm_dtype)
    acc_ref[...] = jnp.zeros_like(acc_ref)                             # reuse as FF accumulator

    @pl.loop(0, n_ff)
    def _ff(t):
        h_t = jnp.dot(xn2_mm, w1_ref[t], preferred_element_type=jnp.float32) + b1_ref[t]
        h_t = _gelu_tanh(h_t)
        acc_ref[...] += jnp.dot(h_t.astype(mm_dtype), w2_ref[t],
                                preferred_element_type=jnp.float32)

    o_ref[0] = (acc_ref[...] + b2_ref[0] + x1).astype(o_ref.dtype)


def _physical_vmem_bytes():
    try:
        cap = getattr(pltpu.get_tpu_info(), "vmem_capacity_bytes", None)
        if cap:
            return int(cap)
    except Exception:
        pass
    return 128 << 20  # v5e/v6e default


def _default_exp_dtype(weight_dtype):
    """bf16 softmax exp only on v6e/v7x and only when the matmul path is already bf16."""
    try:
        if jnp.dtype(weight_dtype) != jnp.dtype(jnp.bfloat16):
            return jnp.float32
        kind = jax.devices()[0].device_kind.lower()
        if ("v6" in kind) or ("v7" in kind):
            return jnp.bfloat16
    except Exception:
        pass
    return jnp.float32


def _copy_kernel(x_ref, o_ref):
    o_ref[...] = x_ref[...]


@functools.lru_cache(maxsize=1)
def _single_buffer_supported():
    """Narrow build-time probe: does this jax build accept pl.Buffered(1) single-buffering?"""
    try:
        fn = pl.pallas_call(
            _copy_kernel,
            out_shape=jax.ShapeDtypeStruct((16, 128), jnp.float32),
            grid_spec=pltpu.PrefetchScalarGridSpec(
                num_scalar_prefetch=0,
                grid=(2,),
                in_specs=[pl.BlockSpec((8, 128), lambda i: (0, 0),
                                       pipeline_mode=pl.Buffered(1))],
                out_specs=pl.BlockSpec((8, 128), lambda i: (i, 0)),
            ),
        )
        jax.block_until_ready(fn(jnp.zeros((8, 128), jnp.float32)))
        return True
    except Exception:
        return False


def _vmem_limit_bytes(S, D, num_heads, kv_tile, ff_tile, w_itemsize, x_itemsize,
                      single_buffer):
    """VMEM request: actual need (no double-counting), capped generation-aware."""
    hd = D // num_heads
    Dh = 4 * D
    wbuf = 1 if single_buffer else 2
    big_weights = (3 * D * D + D * D + D * Dh + Dh * D) * w_itemsize * wbuf
    small_params = (6 * D + Dh) * 4 * wbuf
    io_blocks = 2 * 2 * S * D * x_itemsize                      # x + out, double-buffered
    scratch = (S * D + S * hd + 2 * S) * 4 + 2 * S * hd * w_itemsize
    transient = (4 * S * D + 3 * S * hd + 3 * S * kv_tile + 2 * S * ff_tile) * 4
    need = big_weights + small_params + io_blocks + scratch + transient + (2 << 20)
    cap = int(0.85 * _physical_vmem_bytes())                    # ~110 MiB v5e/v6e, ~54 MiB v7x
    return int(max(min(need, cap), min(32 << 20, cap)))


def transformer_block(x, params, num_heads):
    B, S, D = x.shape
    assert D % num_heads == 0, "emb_dim must be divisible by n_heads"
    hd = D // num_heads
    Dh = 4 * D
    wqkv = params["wqkv"]
    assert wqkv.shape == (D, 3 * D), "expected fused (D, 3D) QKV weight"
    mm_dtype = wqkv.dtype
    w_itemsize = jnp.dtype(mm_dtype).itemsize

    # In-kernel tile sizes (single tile at toy shapes).
    kv_tile = 512 if (S > 512 and S % 512 == 0) else S
    ff_tile = 512 if (Dh > 512 and Dh % 512 == 0) else Dh
    n_ff = Dh // ff_tile

    # Host-side weight re-layouts: per-head / per-FF-tile slabs on a leading axis so the
    # kernel can index them with ref[h] / ref[t] (no dynamic lane-dim slicing).
    wq, wk, wv = wqkv[:, :D], wqkv[:, D:2 * D], wqkv[:, 2 * D:]
    per_head = lambda w: w.reshape(D, num_heads, hd).transpose(1, 0, 2)   # (H, D, hd)
    wqkv_heads = jnp.concatenate([per_head(wq), per_head(wk), per_head(wv)], axis=-1)
    wo_heads = params["wo"].reshape(num_heads, hd, D)
    w1_t = params["w1"].reshape(D, n_ff, ff_tile).transpose(1, 0, 2)      # (n_ff, D, tf)
    b1_t = params["b1"].reshape(1, n_ff, ff_tile).transpose(1, 0, 2)      # (n_ff, 1, tf)
    w2_t = params["w2"].reshape(n_ff, ff_tile, D)                         # (n_ff, tf, D)

    single_buffer = _single_buffer_supported()
    exp_dtype = _default_exp_dtype(mm_dtype)

    kernel = functools.partial(transformer_block_kernel, num_heads=num_heads,
                               kv_tile=kv_tile, exp_dtype=exp_dtype)

    def wspec(shape):
        # Constant across the batch grid; single-buffering halves resident weight VMEM.
        if single_buffer:
            return pl.BlockSpec(shape, lambda b: (0,) * len(shape),
                                pipeline_mode=pl.Buffered(1))
        return pl.BlockSpec(shape, lambda b: (0,) * len(shape))

    fn = pl.pallas_call(
        kernel,
        out_shape=jax.ShapeDtypeStruct((B, S, D), x.dtype),
        grid_spec=pltpu.PrefetchScalarGridSpec(
            num_scalar_prefetch=0,
            grid=(B,),
            in_specs=[
                pl.BlockSpec((1, S, D), lambda b: (b, 0, 0)),            # x
                wspec((num_heads, D, 3 * hd)),                           # Wqkv per-head
                wspec((num_heads, hd, D)), wspec((1, D)),                # Wo per-head, bo
                wspec((n_ff, D, ff_tile)), wspec((n_ff, 1, ff_tile)),    # W1, b1 (FF tiles)
                wspec((n_ff, ff_tile, D)), wspec((1, D)),                # W2, b2
                wspec((1, D)), wspec((1, D)),                            # ln1 scale/shift
                wspec((1, D)), wspec((1, D)),                            # ln2 scale/shift
            ],
            out_specs=pl.BlockSpec((1, S, D), lambda b: (b, 0, 0)),
            scratch_shapes=[
                pltpu.VMEM((S, D), jnp.float32),     # attn-out / FF accumulator
                pltpu.VMEM((S, hd), jnp.float32),    # per-head AV accumulator
                pltpu.VMEM((S, 1), jnp.float32),     # online-softmax running max
                pltpu.VMEM((S, 1), jnp.float32),     # online-softmax running sum
                pltpu.VMEM((S, hd), mm_dtype),       # current head K
                pltpu.VMEM((S, hd), mm_dtype),       # current head V
            ],
        ),
        compiler_params=pltpu.CompilerParams(
            dimension_semantics=("parallel",),
            vmem_limit_bytes=_vmem_limit_bytes(S, D, num_heads, kv_tile, ff_tile,
                                               w_itemsize, x.dtype.itemsize,
                                               single_buffer),
        ),
    )
    return fn(x, wqkv_heads, wo_heads, params["bo"],
              w1_t, b1_t, w2_t, params["b2"],
              params["g1"], params["s1"], params["g2"], params["s2"])


def init_params(key, emb_dim):
    D, Dh = emb_dim, 4 * emb_dim
    ks = jax.random.split(key, 6)
    scale = 0.02
    return {
        "wqkv": scale * jax.random.normal(ks[0], (D, 3 * D), jnp.float32),
        "wo":   scale * jax.random.normal(ks[1], (D, D), jnp.float32),
        "bo":   scale * jax.random.normal(ks[2], (1, D), jnp.float32),
        "w1":   scale * jax.random.normal(ks[3], (D, Dh), jnp.float32),
        "b1":   scale * jax.random.normal(ks[4], (1, Dh), jnp.float32),
        "w2":   scale * jax.random.normal(ks[5], (Dh, D), jnp.float32),
        "b2":   jnp.zeros((1, D), jnp.float32),
        "g1":   jnp.ones((1, D), jnp.float32),
        "s1":   jnp.zeros((1, D), jnp.float32),
        "g2":   jnp.ones((1, D), jnp.float32),
        "s2":   jnp.zeros((1, D), jnp.float32),
    }


def cast_matmul_weights(params, dtype):
    """Cast only the MXU weight matrices (biases / LN params stay f32)."""
    mm = ("wqkv", "wo", "w1", "w2")
    return {k: (v.astype(dtype) if k in mm else v) for k, v in params.items()}


def reference_transformer_block(x, params, num_heads):
    """Pure-JAX f32 reference mirroring the PyTorch forward (dropout = identity)."""
    B, S, D = x.shape
    hd = D // num_heads
    f32 = lambda a: a.astype(jnp.float32)
    wqkv = f32(params["wqkv"])
    wq, wk, wv = wqkv[:, :D], wqkv[:, D:2 * D], wqkv[:, 2 * D:]

    def ln(v, g, b):
        m = jnp.mean(v, axis=-1, keepdims=True)
        var = jnp.mean((v - m) ** 2, axis=-1, keepdims=True)
        return g * (v - m) / jnp.sqrt(var + 1e-5) + b

    xn = ln(x, params["g1"][0], params["s1"][0])
    q = (xn @ wq).reshape(B, S, num_heads, hd).transpose(0, 2, 1, 3)
    k = (xn @ wk).reshape(B, S, num_heads, hd).transpose(0, 2, 1, 3)
    v = (xn @ wv).reshape(B, S, num_heads, hd).transpose(0, 2, 1, 3)
    scores = q @ k.transpose(0, 1, 3, 2)
    mask = jnp.triu(jnp.ones((S, S), bool), k=1)
    scores = jnp.where(mask, -jnp.inf, scores) / jnp.sqrt(jnp.float32(hd))
    attn = jax.nn.softmax(scores, axis=-1)
    ctx = (attn @ v).transpose(0, 2, 1, 3).reshape(B, S, D)
    x1 = ctx @ f32(params["wo"]) + params["bo"][0] + x
    xn2 = ln(x1, params["g2"][0], params["s2"][0])
    h = xn2 @ f32(params["w1"]) + params["b1"][0]
    h = 0.5 * h * (1 + jnp.tanh(jnp.sqrt(2.0 / jnp.pi) * (h + 0.044715 * h ** 3)))
    return h @ f32(params["w2"]) + params["b2"][0] + x1


if __name__ == "__main__":
    cfg = {"emb_dim": 32, "context_length": 8, "n_heads": 4,
           "drop_rate": 0.0, "qkv_bias": False}
    B, S, D = 2, cfg["context_length"], cfg["emb_dim"]

    key = jax.random.PRNGKey(0)
    kx, kp = jax.random.split(key)
    x = jax.random.normal(kx, (B, S, D), jnp.float32)
    params = init_params(kp, D)

    ref = reference_transformer_block(x, params, cfg["n_heads"])

    # f32 weights: tight check against the reference.
    out = jax.block_until_ready(transformer_block(x, params, cfg["n_heads"]))
    assert out.shape == (B, S, D)
    err = float(jnp.max(jnp.abs(out - ref)))
    assert err < 2e-3, f"f32 path max abs err {err}"

    # bf16 weights (f32 accumulation, bf16 softmax exp on v6e/v7x): fast path, looser check.
    params_bf16 = cast_matmul_weights(params, jnp.bfloat16)
    out_bf16 = jax.block_until_ready(transformer_block(x, params_bf16, cfg["n_heads"]))
    err_bf16 = float(jnp.max(jnp.abs(out_bf16.astype(jnp.float32) - ref)))
    assert err_bf16 < 2e-2, f"bf16 path max abs err {err_bf16}"

    print("KERNEL_OK")
</pallas_src>

<mosaic_0001>
module attributes {stable_mosaic.version = 11 : i64} {
  func.func @_copy_kernel(%arg0: i32, %arg1: memref<8x128xf32, #tpu.memory_space<vmem>>, %arg2: memref<8x128xf32, #tpu.memory_space<vmem>>) attributes {dimension_semantics = [#tpu.dimension_semantics<arbitrary>], iteration_bounds = array<i64: 2>, scalar_prefetch = 0 : i64, scratch_operands = 0 : i64, tpu.core_type = #tpu.core_type<tc>, window_params = [{pipeline_mode = #tpu.pipeline_mode<synchronous>, transform_indices = @transform_0, window_bounds = array<i64: 8, 128>}, {transform_indices = @transform_1, window_bounds = array<i64: 8, 128>}]} {
    %c0 = arith.constant 0 : index
    %c0_0 = arith.constant 0 : index
    %0 = vector.load %arg1[%c0, %c0_0] : memref<8x128xf32, #tpu.memory_space<vmem>>, vector<8x128xf32>
    %c0_1 = arith.constant 0 : index
    %c0_2 = arith.constant 0 : index
    %1 = vector.load %arg2[%c0_1, %c0_2] : memref<8x128xf32, #tpu.memory_space<vmem>>, vector<8x128xf32>
    tpu.vector_store %arg2[%c0_1, %c0_2], %0 {strides = array<i32>} : memref<8x128xf32, #tpu.memory_space<vmem>>, vector<8x128xf32>,
    return
  }
  func.func @transform_0(%arg0: i32) -> (i32, i32) {
    %c0_i32 = arith.constant 0 : i32
    %c0_i32_0 = arith.constant 0 : i32
    %c0_i32_1 = arith.constant 0 : i32
    return %c0_i32, %c0_i32_0 : i32, i32
  }
  func.func @transform_1(%arg0: i32) -> (i32, i32) {
    %c0_i32 = arith.constant 0 : i32
    %c0_i32_0 = arith.constant 0 : i32
    return %arg0, %c0_i32 : i32, i32
  }
}

module attributes {stable_mosaic.version = 11 : i64} {
  func.func @transformer_block_kernel(%arg0: i32, %arg1: memref<1x8x32xf32, #tpu.memory_space<vmem>>, %arg2: memref<4x32x24xf32, #tpu.memory_space<vmem>>, %arg3: memref<4x8x32xf32, #tpu.memory_space<vmem>>, %arg4: memref<1x32xf32, #tpu.memory_space<vmem>>, %arg5: memref<1x32x128xf32, #tpu.memory_space<vmem>>, %arg6: memref<1x1x128xf32, #tpu.memory_space<vmem>>, %arg7: memref<1x128x32xf32, #tpu.memory_space<vmem>>, %arg8: memref<1x32xf32, #tpu.memory_space<vmem>>, %arg9: memref<1x32xf32, #tpu.memory_space<vmem>>, %arg10: memref<1x32xf32, #tpu.memory_space<vmem>>, %arg11: memref<1x32xf32, #tpu.memory_space<vmem>>, %arg12: memref<1x32xf32, #tpu.memory_space<vmem>>, %arg13: memref<1x8x32xf32, #tpu.memory_space<vmem>>, %arg14: memref<8x32xf32, #tpu.memory_space<vmem>>, %arg15: memref<8x8xf32, #tpu.memory_space<vmem>>, %arg16: memref<8x1xf32, #tpu.memory_space<vmem>>, %arg17: memref<8x1xf32, #tpu.memory_space<vmem>>, %arg18: memref<8x8xf32, #tpu.memory_space<vmem>>, %arg19: memref<8x8xf32, #tpu.memory_space<vmem>>) attributes {dimension_semantics = [#tpu.dimension_semantics<parallel>], iteration_bounds = array<i64: 2>, scalar_prefetch = 0 : i64, scratch_operands = 6 : i64, tpu.core_type = #tpu.core_type<tc>, window_params = [{transform_indices = @transform_0, window_bounds = array<i64: 1, 8, 32>}, {pipeline_mode = #tpu.pipeline_mode<synchronous>, transform_indices = @transform_1, window_bounds = array<i64: 4, 32, 24>}, {pipeline_mode = #tpu.pipeline_mode<synchronous>, transform_indices = @transform_2, window_bounds = array<i64: 4, 8, 32>}, {pipeline_mode = #tpu.pipeline_mode<synchronous>, transform_indices = @transform_3, window_bounds = array<i64: 1, 32>}, {pipeline_mode = #tpu.pipeline_mode<synchronous>, transform_indices = @transform_4, window_bounds = array<i64: 1, 32, 128>}, {pipeline_mode = #tpu.pipeline_mode<synchronous>, transform_indices = @transform_5, window_bounds = array<i64: 1, 1, 128>}, {pipeline_mode = #tpu.pipeline_mode<synchronous>, transform_indices = @transform_6, window_bounds = array<i64: 1, 128, 32>}, {pipeline_mode = #tpu.pipeline_mode<synchronous>, transform_indices = @transform_7, window_bounds = array<i64: 1, 32>}, {pipeline_mode = #tpu.pipeline_mode<synchronous>, transform_indices = @transform_8, window_bounds = array<i64: 1, 32>}, {pipeline_mode = #tpu.pipeline_mode<synchronous>, transform_indices = @transform_9, window_bounds = array<i64: 1, 32>}, {pipeline_mode = #tpu.pipeline_mode<synchronous>, transform_indices = @transform_10, window_bounds = array<i64: 1, 32>}, {pipeline_mode = #tpu.pipeline_mode<synchronous>, transform_indices = @transform_11, window_bounds = array<i64: 1, 32>}, {transform_indices = @transform_12, window_bounds = array<i64: 1, 8, 32>}]} {
    %c0 = arith.constant 0 : index
    %c0_0 = arith.constant 0 : index
    %c0_1 = arith.constant 0 : index
    %0 = vector.load %arg1[%c0, %c0_0, %c0_1] : memref<1x8x32xf32, #tpu.memory_space<vmem>>, vector<1x8x32xf32>
    %1 = vector.shape_cast %0 : vector<1x8x32xf32> to vector<8x32xf32>
    %c0_2 = arith.constant 0 : index
    %c0_3 = arith.constant 0 : index
    %2 = vector.load %arg9[%c0_2, %c0_3] : memref<1x32xf32, #tpu.memory_space<vmem>>, vector<1x32xf32>
    %3 = vector.shape_cast %2 : vector<1x32xf32> to vector<32xf32>
    %c0_4 = arith.constant 0 : index
    %c0_5 = arith.constant 0 : index
    %4 = vector.load %arg10[%c0_4, %c0_5] : memref<1x32xf32, #tpu.memory_space<vmem>>, vector<1x32xf32>
    %5 = vector.shape_cast %4 : vector<1x32xf32> to vector<32xf32>
    %cst = arith.constant dense<0.000000e+00> : vector<8xf32>
    %6 = vector.multi_reduction <add>, %1, %cst [1] : vector<8x32xf32> to vector<8xf32>
    %7 = vector.shape_cast %6 : vector<8xf32> to vector<8x1xf32>
    %cst_6 = arith.constant 3.200000e+01 : f32
    %8 = vector.broadcast %cst_6 : f32 to vector<8x1xf32>
    %9 = arith.divf %7, %8 : vector<8x1xf32>
    %10 = vector.broadcast %9 : vector<8x1xf32> to vector<8x32xf32>
    %11 = arith.subf %1, %10 : vector<8x32xf32>
    %12 = arith.mulf %11, %11 : vector<8x32xf32>
    %cst_7 = arith.constant dense<0.000000e+00> : vector<8xf32>
    %13 = vector.multi_reduction <add>, %12, %cst_7 [1] : vector<8x32xf32> to vector<8xf32>
    %14 = vector.shape_cast %13 : vector<8xf32> to vector<8x1xf32>
    %cst_8 = arith.constant 3.200000e+01 : f32
    %15 = vector.broadcast %cst_8 : f32 to vector<8x1xf32>
    %16 = arith.divf %14, %15 : vector<8x1xf32>
    %17 = vector.broadcast %9 : vector<8x1xf32> to vector<8x32xf32>
    %18 = arith.subf %1, %17 : vector<8x32xf32>
    %cst_9 = arith.constant 9.99999974E-6 : f32
    %19 = vector.broadcast %cst_9 : f32 to vector<8x1xf32>
    %20 = arith.addf %16, %19 : vector<8x1xf32>
    %21 = math.rsqrt %20 : vector<8x1xf32>
    %22 = vector.broadcast %21 : vector<8x1xf32> to vector<8x32xf32>
    %23 = arith.mulf %18, %22 : vector<8x32xf32>
    %24 = vector.shape_cast %3 : vector<32xf32> to vector<1x32xf32>
    %25 = vector.broadcast %24 : vector<1x32xf32> to vector<8x32xf32>
    %26 = arith.mulf %25, %23 : vector<8x32xf32>
    %27 = vector.shape_cast %5 : vector<32xf32> to vector<1x32xf32>
    %28 = vector.broadcast %27 : vector<1x32xf32> to vector<8x32xf32>
    %29 = arith.addf %26, %28 : vector<8x32xf32>
    %30 = tpu.iota {dimensions = array<i32: 0>} : vector<8x8xi32>
    %cst_10 = arith.constant 0.000000e+00 : f32
    %31 = vector.broadcast %cst_10 : f32 to vector<8x32xf32>
    %c0_11 = arith.constant 0 : index
    %c0_12 = arith.constant 0 : index
    %32 = vector.load %arg14[%c0_11, %c0_12] : memref<8x32xf32, #tpu.memory_space<vmem>>, vector<8x32xf32>
    tpu.vector_store %arg14[%c0_11, %c0_12], %31 {strides = array<i32>} : memref<8x32xf32, #tpu.memory_space<vmem>>, vector<8x32xf32>,
    %cst_13 = arith.constant 0.353553385 : f32
    %cst_14 = arith.constant -1.000000e+30 : f32
    %c0_i32 = arith.constant 0 : i32
    %c4_i32 = arith.constant 4 : i32
    %33 = arith.addi %c0_i32, %c4_i32 : i32
    %c1_i32 = arith.constant 1 : i32
    scf.for %arg20 = %c0_i32 to %33 step %c1_i32  : i32 {
      %c1_i32_59 = arith.constant 1 : i32
      %113 = arith.muli %arg20, %c1_i32_59 : i32
      %c0_i32_60 = arith.constant 0 : i32
      %114 = arith.addi %c0_i32_60, %113 : i32
      %115 = arith.index_cast %114 : i32 to index
      %c0_61 = arith.constant 0 : index
      %c0_62 = arith.constant 0 : index
      %116 = vector.load %arg2[%115, %c0_61, %c0_62] : memref<4x32x24xf32, #tpu.memory_space<vmem>>, vector<1x32x24xf32>
      %117 = vector.shape_cast %116 : vector<1x32x24xf32> to vector<32x24xf32>
      %cst_63 = arith.constant dense<0.000000e+00> : vector<8x24xf32>
      %118 = tpu.matmul %29, %117, %cst_63 {dimension_numbers = #tpu.dot_dimension_numbers<[1], [0], [0], [1], [0, 0, 1, 1], [], []>} : vector<8x32xf32>, vector<32x24xf32>, vector<8x24xf32> -> vector<8x24xf32>
      %119 = vector.extract_strided_slice %118 {offsets = [0, 0], sizes = [8, 8], strides = [1, 1]} : vector<8x24xf32> to vector<8x8xf32>
      %120 = vector.broadcast %cst_13 : f32 to vector<8x8xf32>
      %121 = arith.mulf %119, %120 : vector<8x8xf32>
      %122 = vector.extract_strided_slice %118 {offsets = [0, 8], sizes = [8, 8], strides = [1, 1]} : vector<8x24xf32> to vector<8x8xf32>
      %c0_64 = arith.constant 0 : index
      %c0_65 = arith.constant 0 : index
      %123 = vector.load %arg18[%c0_64, %c0_65] : memref<8x8xf32, #tpu.memory_space<vmem>>, vector<8x8xf32>
      tpu.vector_store %arg18[%c0_64, %c0_65], %122 {strides = array<i32>} : memref<8x8xf32, #tpu.memory_space<vmem>>, vector<8x8xf32>,
      %124 = vector.extract_strided_slice %118 {offsets = [0, 16], sizes = [8, 8], strides = [1, 1]} : vector<8x24xf32> to vector<8x8xf32>
      %c0_66 = arith.constant 0 : index
      %c0_67 = arith.constant 0 : index
      %125 = vector.load %arg19[%c0_66, %c0_67] : memref<8x8xf32, #tpu.memory_space<vmem>>, vector<8x8xf32>
      tpu.vector_store %arg19[%c0_66, %c0_67], %124 {strides = array<i32>} : memref<8x8xf32, #tpu.memory_space<vmem>>, vector<8x8xf32>,
      %126 = vector.broadcast %cst_14 : f32 to vector<8x1xf32>
      %c0_68 = arith.constant 0 : index
      %c0_69 = arith.constant 0 : index
      %127 = vector.load %arg16[%c0_68, %c0_69] : memref<8x1xf32, #tpu.memory_space<vmem>>, vector<8x1xf32>
      tpu.vector_store %arg16[%c0_68, %c0_69], %126 {strides = array<i32>} : memref<8x1xf32, #tpu.memory_space<vmem>>, vector<8x1xf32>,
      %cst_70 = arith.constant 0.000000e+00 : f32
      %128 = vector.broadcast %cst_70 : f32 to vector<8x1xf32>
      %c0_71 = arith.constant 0 : index
      %c0_72 = arith.constant 0 : index
      %129 = vector.load %arg17[%c0_71, %c0_72] : memref<8x1xf32, #tpu.memory_space<vmem>>, vector<8x1xf32>
      tpu.vector_store %arg17[%c0_71, %c0_72], %128 {strides = array<i32>} : memref<8x1xf32, #tpu.memory_space<vmem>>, vector<8x1xf32>,
      %cst_73 = arith.constant 0.000000e+00 : f32
      %130 = vector.broadcast %cst_73 : f32 to vector<8x8xf32>
      %c0_74 = arith.constant 0 : index
      %c0_75 = arith.constant 0 : index
      %131 = vector.load %arg15[%c0_74, %c0_75] : memref<8x8xf32, #tpu.memory_space<vmem>>, vector<8x8xf32>
      tpu.vector_store %arg15[%c0_74, %c0_75], %130 {strides = array<i32>} : memref<8x8xf32, #tpu.memory_space<vmem>>, vector<8x8xf32>,
      %c0_i32_76 = arith.constant 0 : i32
      %c1_i32_77 = arith.constant 1 : i32
      %132 = arith.muli %c0_i32_76, %c1_i32_77 : i32
      %c0_i32_78 = arith.constant 0 : i32
      %133 = arith.addi %c0_i32_78, %132 : i32
      %c8_i32 = arith.constant 8 : i32
      %134 = arith.muli %133, %c8_i32 : i32
      %135 = tpu.assume_multiple %134, 8 : i32
      %136 = arith.index_cast %135 : i32 to index
      %c0_79 = arith.constant 0 : index
      %137 = vector.load %arg18[%136, %c0_79] : memref<8x8xf32, #tpu.memory_space<vmem>>, vector<8x8xf32>
      %138 = arith.index_cast %135 : i32 to index
      %c0_80 = arith.constant 0 : index
      %139 = vector.load %arg19[%138, %c0_80] : memref<8x8xf32, #tpu.memory_space<vmem>>, vector<8x8xf32>
      %cst_81 = arith.constant dense<0.000000e+00> : vector<8x8xf32>
      %140 = tpu.matmul %121, %137, %cst_81 {dimension_numbers = #tpu.dot_dimension_numbers<[1], [1], [0], [0], [0, 0, 1, 0], [], []>} : vector<8x8xf32>, vector<8x8xf32>, vector<8x8xf32> -> vector<8x8xf32>
      %141 = tpu.iota {dimensions = array<i32: 1>} : vector<8x8xi32>
      %142 = vector.broadcast %135 : i32 to vector<8x8xi32>
      %143 = arith.addi %142, %141 : vector<8x8xi32>
      %144 = arith.cmpi sgt, %143, %30 : vector<8x8xi32>
      %145 = vector.broadcast %cst_14 : f32 to vector<8x8xf32>
      %146 = arith.select %144, %145, %140 : vector<8x8xi1>, vector<8x8xf32>
      %c0_82 = arith.constant 0 : index
      %c0_83 = arith.constant 0 : index
      %147 = vector.load %arg16[%c0_82, %c0_83] : memref<8x1xf32, #tpu.memory_space<vmem>>, vector<8x1xf32>
      %cst_84 = arith.constant dense<0xFF800000> : vector<8xf32>
      %148 = vector.multi_reduction <maximumf>, %146, %cst_84 [1] : vector<8x8xf32> to vector<8xf32>
      %149 = vector.shape_cast %148 : vector<8xf32> to vector<8x1xf32>
      %150 = arith.maximumf %147, %149 : vector<8x1xf32>
      %151 = arith.subf %147, %150 : vector<8x1xf32>
      %152 = math.exp %151 : vector<8x1xf32>
      %153 = vector.broadcast %150 : vector<8x1xf32> to vector<8x8xf32>
      %154 = arith.subf %146, %153 : vector<8x8xf32>
      %155 = math.exp %154 : vector<8x8xf32>
      %c0_85 = arith.constant 0 : index
      %c0_86 = arith.constant 0 : index
      %156 = vector.load %arg17[%c0_85, %c0_86] : memref<8x1xf32, #tpu.memory_space<vmem>>, vector<8x1xf32>
      %157 = arith.mulf %152, %156 : vector<8x1xf32>
      %cst_87 = arith.constant dense<0.000000e+00> : vector<8xf32>
      %158 = vector.multi_reduction <add>, %155, %cst_87 [1] : vector<8x8xf32> to vector<8xf32>
      %159 = vector.shape_cast %158 : vector<8xf32> to vector<8x1xf32>
      %160 = arith.addf %157, %159 : vector<8x1xf32>
      %c0_88 = arith.constant 0 : index
      %c0_89 = arith.constant 0 : index
      %161 = vector.load %arg17[%c0_88, %c0_89] : memref<8x1xf32, #tpu.memory_space<vmem>>, vector<8x1xf32>
      tpu.vector_store %arg17[%c0_88, %c0_89], %160 {strides = array<i32>} : memref<8x1xf32, #tpu.memory_space<vmem>>, vector<8x1xf32>,
      %c0_90 = arith.constant 0 : index
      %c0_91 = arith.constant 0 : index
      %162 = vector.load %arg15[%c0_90, %c0_91] : memref<8x8xf32, #tpu.memory_space<vmem>>, vector<8x8xf32>
      %163 = vector.broadcast %152 : vector<8x1xf32> to vector<8x8xf32>
      %164 = arith.mulf %163, %162 : vector<8x8xf32>
      %cst_92 = arith.constant dense<0.000000e+00> : vector<8x8xf32>
      %165 = tpu.matmul %155, %139, %cst_92 {dimension_numbers = #tpu.dot_dimension_numbers<[1], [0], [0], [1], [0, 0, 1, 1], [], []>} : vector<8x8xf32>, vector<8x8xf32>, vector<8x8xf32> -> vector<8x8xf32>
      %166 = arith.addf %164, %165 : vector<8x8xf32>
      %c0_93 = arith.constant 0 : index
      %c0_94 = arith.constant 0 : index
      %167 = vector.load %arg15[%c0_93, %c0_94] : memref<8x8xf32, #tpu.memory_space<vmem>>, vector<8x8xf32>
      tpu.vector_store %arg15[%c0_93, %c0_94], %166 {strides = array<i32>} : memref<8x8xf32, #tpu.memory_space<vmem>>, vector<8x8xf32>,
      %c0_95 = arith.constant 0 : index
      %c0_96 = arith.constant 0 : index
      %168 = vector.load %arg16[%c0_95, %c0_96] : memref<8x1xf32, #tpu.memory_space<vmem>>, vector<8x1xf32>
      tpu.vector_store %arg16[%c0_95, %c0_96], %150 {strides = array<i32>} : memref<8x1xf32, #tpu.memory_space<vmem>>, vector<8x1xf32>,
      %c1_i32_97 = arith.constant 1 : i32
      %c0_98 = arith.constant 0 : index
      %c0_99 = arith.constant 0 : index
      %169 = vector.load %arg15[%c0_98, %c0_99] : memref<8x8xf32, #tpu.memory_space<vmem>>, vector<8x8xf32>
      %c0_100 = arith.constant 0 : index
      %c0_101 = arith.constant 0 : index
      %170 = vector.load %arg17[%c0_100, %c0_101] : memref<8x1xf32, #tpu.memory_space<vmem>>, vector<8x1xf32>
      %171 = tpu.reciprocal %170 {approx = true} : vector<8x1xf32> -> vector<8x1xf32>
      %172 = vector.broadcast %171 : vector<8x1xf32> to vector<8x8xf32>
      %173 = arith.mulf %169, %172 : vector<8x8xf32>
      %c0_102 = arith.constant 0 : index
      %c0_103 = arith.constant 0 : index
      %174 = vector.load %arg14[%c0_102, %c0_103] : memref<8x32xf32, #tpu.memory_space<vmem>>, vector<8x32xf32>
      %175 = arith.index_cast %114 : i32 to index
      %c0_104 = arith.constant 0 : index
      %c0_105 = arith.constant 0 : index
      %176 = vector.load %arg3[%175, %c0_104, %c0_105] : memref<4x8x32xf32, #tpu.memory_space<vmem>>, vector<1x8x32xf32>
      %177 = vector.shape_cast %176 : vector<1x8x32xf32> to vector<8x32xf32>
      %cst_106 = arith.constant dense<0.000000e+00> : vector<8x32xf32>
      %178 = tpu.matmul %173, %177, %cst_106 {dimension_numbers = #tpu.dot_dimension_numbers<[1], [0], [0], [1], [0, 0, 1, 1], [], []>} : vector<8x8xf32>, vector<8x32xf32>, vector<8x32xf32> -> vector<8x32xf32>
      %179 = arith.addf %174, %178 : vector<8x32xf32>
      %c0_107 = arith.constant 0 : index
      %c0_108 = arith.constant 0 : index
      %180 = vector.load %arg14[%c0_107, %c0_108] : memref<8x32xf32, #tpu.memory_space<vmem>>, vector<8x32xf32>
      tpu.vector_store %arg14[%c0_107, %c0_108], %179 {strides = array<i32>} : memref<8x32xf32, #tpu.memory_space<vmem>>, vector<8x32xf32>,
    }
    %c4_i32_15 = arith.constant 4 : i32
    %c0_16 = arith.constant 0 : index
    %c0_17 = arith.constant 0 : index
    %34 = vector.load %arg14[%c0_16, %c0_17] : memref<8x32xf32, #tpu.memory_space<vmem>>, vector<8x32xf32>
    %c0_18 = arith.constant 0 : index
    %c0_19 = arith.constant 0 : index
    %35 = vector.load %arg4[%c0_18, %c0_19] : memref<1x32xf32, #tpu.memory_space<vmem>>, vector<1x32xf32>
    %36 = vector.shape_cast %35 : vector<1x32xf32> to vector<32xf32>
    %37 = vector.shape_cast %36 : vector<32xf32> to vector<1x32xf32>
    %38 = vector.broadcast %37 : vector<1x32xf32> to vector<8x32xf32>
    %39 = arith.addf %34, %38 : vector<8x32xf32>
    %40 = arith.addf %39, %1 : vector<8x32xf32>
    %c0_20 = arith.constant 0 : index
    %c0_21 = arith.constant 0 : index
    %41 = vector.load %arg11[%c0_20, %c0_21] : memref<1x32xf32, #tpu.memory_space<vmem>>, vector<1x32xf32>
    %42 = vector.shape_cast %41 : vector<1x32xf32> to vector<32xf32>
    %c0_22 = arith.constant 0 : index
    %c0_23 = arith.constant 0 : index
    %43 = vector.load %arg12[%c0_22, %c0_23] : memref<1x32xf32, #tpu.memory_space<vmem>>, vector<1x32xf32>
    %44 = vector.shape_cast %43 : vector<1x32xf32> to vector<32xf32>
    %cst_24 = arith.constant dense<0.000000e+00> : vector<8xf32>
    %45 = vector.multi_reduction <add>, %40, %cst_24 [1] : vector<8x32xf32> to vector<8xf32>
    %46 = vector.shape_cast %45 : vector<8xf32> to vector<8x1xf32>
    %cst_25 = arith.constant 3.200000e+01 : f32
    %47 = vector.broadcast %cst_25 : f32 to vector<8x1xf32>
    %48 = arith.divf %46, %47 : vector<8x1xf32>
    %49 = vector.broadcast %48 : vector<8x1xf32> to vector<8x32xf32>
    %50 = arith.subf %40, %49 : vector<8x32xf32>
    %51 = arith.mulf %50, %50 : vector<8x32xf32>
    %cst_26 = arith.constant dense<0.000000e+00> : vector<8xf32>
    %52 = vector.multi_reduction <add>, %51, %cst_26 [1] : vector<8x32xf32> to vector<8xf32>
    %53 = vector.shape_cast %52 : vector<8xf32> to vector<8x1xf32>
    %cst_27 = arith.constant 3.200000e+01 : f32
    %54 = vector.broadcast %cst_27 : f32 to vector<8x1xf32>
    %55 = arith.divf %53, %54 : vector<8x1xf32>
    %56 = vector.broadcast %48 : vector<8x1xf32> to vector<8x32xf32>
    %57 = arith.subf %40, %56 : vector<8x32xf32>
    %cst_28 = arith.constant 9.99999974E-6 : f32
    %58 = vector.broadcast %cst_28 : f32 to vector<8x1xf32>
    %59 = arith.addf %55, %58 : vector<8x1xf32>
    %60 = math.rsqrt %59 : vector<8x1xf32>
    %61 = vector.broadcast %60 : vector<8x1xf32> to vector<8x32xf32>
    %62 = arith.mulf %57, %61 : vector<8x32xf32>
    %63 = vector.shape_cast %42 : vector<32xf32> to vector<1x32xf32>
    %64 = vector.broadcast %63 : vector<1x32xf32> to vector<8x32xf32>
    %65 = arith.mulf %64, %62 : vector<8x32xf32>
    %66 = vector.shape_cast %44 : vector<32xf32> to vector<1x32xf32>
    %67 = vector.broadcast %66 : vector<1x32xf32> to vector<8x32xf32>
    %68 = arith.addf %65, %67 : vector<8x32xf32>
    %cst_29 = arith.constant 0.000000e+00 : f32
    %69 = vector.broadcast %cst_29 : f32 to vector<8x32xf32>
    %c0_30 = arith.constant 0 : index
    %c0_31 = arith.constant 0 : index
    %70 = vector.load %arg14[%c0_30, %c0_31] : memref<8x32xf32, #tpu.memory_space<vmem>>, vector<8x32xf32>
    tpu.vector_store %arg14[%c0_30, %c0_31], %69 {strides = array<i32>} : memref<8x32xf32, #tpu.memory_space<vmem>>, vector<8x32xf32>,
    %c0_i32_32 = arith.constant 0 : i32
    %c1_i32_33 = arith.constant 1 : i32
    %71 = arith.muli %c0_i32_32, %c1_i32_33 : i32
    %c0_i32_34 = arith.constant 0 : i32
    %72 = arith.addi %c0_i32_34, %71 : i32
    %73 = arith.index_cast %72 : i32 to index
    %c0_35 = arith.constant 0 : index
    %c0_36 = arith.constant 0 : index
    %74 = vector.load %arg5[%73, %c0_35, %c0_36] : memref<1x32x128xf32, #tpu.memory_space<vmem>>, vector<1x32x128xf32>
    %75 = vector.shape_cast %74 : vector<1x32x128xf32> to vector<32x128xf32>
    %cst_37 = arith.constant dense<0.000000e+00> : vector<8x128xf32>
    %76 = tpu.matmul %68, %75, %cst_37 {dimension_numbers = #tpu.dot_dimension_numbers<[1], [0], [0], [1], [0, 0, 1, 1], [], []>} : vector<8x32xf32>, vector<32x128xf32>, vector<8x128xf32> -> vector<8x128xf32>
    %77 = arith.index_cast %72 : i32 to index
    %c0_38 = arith.constant 0 : index
    %c0_39 = arith.constant 0 : index
    %78 = vector.load %arg6[%77, %c0_38, %c0_39] : memref<1x1x128xf32, #tpu.memory_space<vmem>>, vector<1x1x128xf32>
    %79 = vector.shape_cast %78 : vector<1x1x128xf32> to vector<1x128xf32>
    %80 = vector.broadcast %79 : vector<1x128xf32> to vector<8x128xf32>
    %81 = arith.addf %76, %80 : vector<8x128xf32>
    %cst_40 = arith.constant 5.000000e-01 : f32
    %82 = vector.broadcast %cst_40 : f32 to vector<8x128xf32>
    %83 = arith.mulf %82, %81 : vector<8x128xf32>
    %cst_41 = arith.constant 0.636619746 : f32
    %84 = math.sqrt %cst_41 : f32
    %85 = arith.mulf %81, %81 : vector<8x128xf32>
    %86 = arith.mulf %81, %85 : vector<8x128xf32>
    %cst_42 = arith.constant 4.471500e-02 : f32
    %87 = vector.broadcast %cst_42 : f32 to vector<8x128xf32>
    %88 = arith.mulf %87, %86 : vector<8x128xf32>
    %89 = arith.addf %81, %88 : vector<8x128xf32>
    %90 = vector.broadcast %84 : f32 to vector<8x128xf32>
    %91 = arith.mulf %90, %89 : vector<8x128xf32>
    %92 = math.tanh %91 : vector<8x128xf32>
    %cst_43 = arith.constant 1.000000e+00 : f32
    %93 = vector.broadcast %cst_43 : f32 to vector<8x128xf32>
    %94 = arith.addf %93, %92 : vector<8x128xf32>
    %95 = arith.mulf %83, %94 : vector<8x128xf32>
    %c0_44 = arith.constant 0 : index
    %c0_45 = arith.constant 0 : index
    %96 = vector.load %arg14[%c0_44, %c0_45] : memref<8x32xf32, #tpu.memory_space<vmem>>, vector<8x32xf32>
    %97 = arith.index_cast %72 : i32 to index
    %c0_46 = arith.constant 0 : index
    %c0_47 = arith.constant 0 : index
    %98 = vector.load %arg7[%97, %c0_46, %c0_47] : memref<1x128x32xf32, #tpu.memory_space<vmem>>, vector<1x128x32xf32>
    %99 = vector.shape_cast %98 : vector<1x128x32xf32> to vector<128x32xf32>
    %cst_48 = arith.constant dense<0.000000e+00> : vector<8x32xf32>
    %100 = tpu.matmul %95, %99, %cst_48 {dimension_numbers = #tpu.dot_dimension_numbers<[1], [0], [0], [1], [0, 0, 1, 1], [], []>} : vector<8x128xf32>, vector<128x32xf32>, vector<8x32xf32> -> vector<8x32xf32>
    %101 = arith.addf %96, %100 : vector<8x32xf32>
    %c0_49 = arith.constant 0 : index
    %c0_50 = arith.constant 0 : index
    %102 = vector.load %arg14[%c0_49, %c0_50] : memref<8x32xf32, #tpu.memory_space<vmem>>, vector<8x32xf32>
    tpu.vector_store %arg14[%c0_49, %c0_50], %101 {strides = array<i32>} : memref<8x32xf32, #tpu.memory_space<vmem>>, vector<8x32xf32>,
    %c1_i32_51 = arith.constant 1 : i32
    %c0_52 = arith.constant 0 : index
    %c0_53 = arith.constant 0 : index
    %103 = vector.load %arg14[%c0_52, %c0_53] : memref<8x32xf32, #tpu.memory_space<vmem>>, vector<8x32xf32>
    %c0_54 = arith.constant 0 : index
    %c0_55 = arith.constant 0 : index
    %104 = vector.load %arg8[%c0_54, %c0_55] : memref<1x32xf32, #tpu.memory_space<vmem>>, vector<1x32xf32>
    %105 = vector.shape_cast %104 : vector<1x32xf32> to vector<32xf32>
    %106 = vector.shape_cast %105 : vector<32xf32> to vector<1x32xf32>
    %107 = vector.broadcast %106 : vector<1x32xf32> to vector<8x32xf32>
    %108 = arith.addf %103, %107 : vector<8x32xf32>
    %109 = arith.addf %108, %40 : vector<8x32xf32>
    %c0_56 = arith.constant 0 : index
    %c0_57 = arith.constant 0 : index
    %c0_58 = arith.constant 0 : index
    %110 = vector.load %arg13[%c0_56, %c0_57, %c0_58] : memref<1x8x32xf32, #tpu.memory_space<vmem>>, vector<1x8x32xf32>
    %111 = vector.shape_cast %110 : vector<1x8x32xf32> to vector<8x32xf32>
    %112 = vector.shape_cast %109 : vector<8x32xf32> to vector<1x8x32xf32>
    tpu.vector_store %arg13[%c0_56, %c0_57, %c0_58], %112 {strides = array<i32>} : memref<1x8x32xf32, #tpu.memory_space<vmem>>, vector<1x8x32xf32>,
    return
  }
  func.func @transform_0(%arg0: i32) -> (i32, i32, i32) {
    %c0_i32 = arith.constant 0 : i32
    %c0_i32_0 = arith.constant 0 : i32
    %c0_i32_1 = arith.constant 0 : i32
    return %arg0, %c0_i32, %c0_i32_0 : i32, i32, i32
  }
  func.func @transform_1(%arg0: i32) -> (i32, i32, i32) {
    %c0_i32 = arith.constant 0 : i32
    %c0_i32_0 = arith.constant 0 : i32
    %c0_i32_1 = arith.constant 0 : i32
    %c0_i32_2 = arith.constant 0 : i32
    return %c0_i32, %c0_i32_0, %c0_i32_1 : i32, i32, i32
  }
  func.func @transform_2(%arg0: i32) -> (i32, i32, i32) {
    %c0_i32 = arith.constant 0 : i32
    %c0_i32_0 = arith.constant 0 : i32
    %c0_i32_1 = arith.constant 0 : i32
    %c0_i32_2 = arith.constant 0 : i32
    return %c0_i32, %c0_i32_0, %c0_i32_1 : i32, i32, i32
  }
  func.func @transform_3(%arg0: i32) -> (i32, i32) {
    %c0_i32 = arith.constant 0 : i32
    %c0_i32_0 = arith.constant 0 : i32
    %c0_i32_1 = arith.constant 0 : i32
    return %c0_i32, %c0_i32_0 : i32, i32
  }
  func.func @transform_4(%arg0: i32) -> (i32, i32, i32) {
    %c0_i32 = arith.constant 0 : i32
    %c0_i32_0 = arith.constant 0 : i32
    %c0_i32_1 = arith.constant 0 : i32
    %c0_i32_2 = arith.constant 0 : i32
    return %c0_i32, %c0_i32_0, %c0_i32_1 : i32, i32, i32
  }
  func.func @transform_5(%arg0: i32) -> (i32, i32, i32) {
    %c0_i32 = arith.constant 0 : i32
    %c0_i32_0 = arith.constant 0 : i32
    %c0_i32_1 = arith.constant 0 : i32
    %c0_i32_2 = arith.constant 0 : i32
    return %c0_i32, %c0_i32_0, %c0_i32_1 : i32, i32, i32
  }
  func.func @transform_6(%arg0: i32) -> (i32, i32, i32) {
    %c0_i32 = arith.constant 0 : i32
    %c0_i32_0 = arith.constant 0 : i32
    %c0_i32_1 = arith.constant 0 : i32
    %c0_i32_2 = arith.constant 0 : i32
    return %c0_i32, %c0_i32_0, %c0_i32_1 : i32, i32, i32
  }
  func.func @transform_7(%arg0: i32) -> (i32, i32) {
    %c0_i32 = arith.constant 0 : i32
    %c0_i32_0 = arith.constant 0 : i32
    %c0_i32_1 = arith.constant 0 : i32
    return %c0_i32, %c0_i32_0 : i32, i32
  }
  func.func @transform_8(%arg0: i32) -> (i32, i32) {
    %c0_i32 = arith.constant 0 : i32
    %c0_i32_0 = arith.constant 0 : i32
    %c0_i32_1 = arith.constant 0 : i32
    return %c0_i32, %c0_i32_0 : i32, i32
  }
  func.func @transform_9(%arg0: i32) -> (i32, i32) {
    %c0_i32 = arith.constant 0 : i32
    %c0_i32_0 = arith.constant 0 : i32
    %c0_i32_1 = arith.constant 0 : i32
    return %c0_i32, %c0_i32_0 : i32, i32
  }
  func.func @transform_10(%arg0: i32) -> (i32, i32) {
    %c0_i32 = arith.constant 0 : i32
    %c0_i32_0 = arith.constant 0 : i32
    %c0_i32_1 = arith.constant 0 : i32
    return %c0_i32, %c0_i32_0 : i32, i32
  }
  func.func @transform_11(%arg0: i32) -> (i32, i32) {
    %c0_i32 = arith.constant 0 : i32
    %c0_i32_0 = arith.constant 0 : i32
    %c0_i32_1 = arith.constant 0 : i32
    return %c0_i32, %c0_i32_0 : i32, i32
  }
  func.func @transform_12(%arg0: i32) -> (i32, i32, i32) {
    %c0_i32 = arith.constant 0 : i32
    %c0_i32_0 = arith.constant 0 : i32
    %c0_i32_1 = arith.constant 0 : i32
    return %arg0, %c0_i32, %c0_i32_0 : i32, i32, i32
  }
}

</mosaic_0001>

<bundles_post_ra>
// kernel: tpu_custom_call.1
= control target key start
LH: loop header
LB: loop body
LE: loop exit
PB: predicated region body
PF: predicated region fallthrough
CT: control target
= control target key end

     0   :  { %6 = vsyncpa [#allocation3], 0  ;;  %s453_s0 = inlined_call_operand.hbm [shape: f32[8,128], index: 0, kind: input, shape index: {}]   ;;  %s454_s1 = inlined_call_operand.hbm [shape: f32[16,128], index: 1, kind: output, shape index: {}]  }
   0x1   :  { %7 = vsyncpa [#allocation4], 0 }
   0x2   :  { %9 = vsyncpa [#allocation4 + $0x1], 0  ;;  %s347_s6 = smov 0   ;;  %s349_s7 = smov 0  }
   0x3   :  { %s351_s8 = smov 0   ;;  %s353_s9 = smov 0  }
   0x4 LB: > { %s368_s10 = sadd.s32 4294967295, %s333_s9   ;;  %s183_s11 = sadd.s32 4294967294, %s333_s9   ;;  %s333_s9 = sphi %s353_s9, %s462_s9   ;;  %s329_s8 = sphi %s351_s8, %s461_s8   ;;  %s325_s7 = sphi %s349_s7, %s460_s7   ;;  %s321_s6 = sphi %s347_s6, %s459_s6  }
   0x5   : > { %s372_s12 = sadd.s32 1, %s333_s9   ;;  %s43_s13 = sadd.s32 1, %s329_s8 }
   0x6   : > { %s40_s14 = ssub.s32 %s333_s9, %s372_s12  ;;  %p53_p0 = scmp.ne.s32.totalorder %s329_s8, %s325_s7 }
   0x7   : > { %p41_p1 = scmp.eq.s32.totalorder %s40_s14, 0  ;;  %p54_p2 = scmp.eq.s32.totalorder %s368_s10, 1 }
   0x8   : > { %p59_p3 = scmp.ne.s32.totalorder %s325_s7, %s321_s6  ;;  %p60_p4 = scmp.eq.s32.totalorder %s183_s11, 1 }
   0x9   : > { %s383_s15 = scalar_select %p41_p1, %s329_s8, %s43_s13  }
   0xa   : > { %p385_p5 = por %p54_p2, %p53_p0  ;;  %p389_p6 = por %p60_p4, %p59_p3 }
   0xb   : > { %p184_p7 = scmp.ge.s32.totalorder %s333_s9, 1  ;;  %p67_p8 = scmp.lt.s32.totalorder %s333_s9, 3 }
   0xc   : > { %s456_s17 = scalar_select %p389_p6, 1, 0 }
   0xd   : > { %p207_p9 = scmp.eq.s32.totalorder %s368_s10, 0  ;;  %p396_p10 = pnand %p184_p7, %p67_p8 }
   0xe   : > { %s335_s19 = smov [#allocation2]  }
   0xf   : > { %s80_s20 = sshll.u32 %s335_s19, 4  ;;  %p199_p11 = pneg %p396_p10  ;;  %s81_s20 = int_to_ptr.vmem [resolvable:$true] %s80_s20 }
  0x10   : > { %s254_s21 = scalar_lea.vmem %s81_s20, 128  ;;  %p262_p3 = scmp.lt.s32.totalorder %s81_s20, %s81_s20 }
  0x11   : > { %p200_p12 = pnand %p207_p9, %p199_p11  ;;  %p255_p0 = scmp.ne.s32.totalorder %s81_s20, %s254_s21 }
  0x12   : > { %p263_p4 = scmp.lt.s32.totalorder %s254_s21, %s254_s21 }
  0x13   : > { %p245_p13 = pneg %p200_p12 }
  0x14   : > { %p264_p6 = por %p263_p4, %p262_p3 }
  0x15   : > { %p257_p1 = pnand %p255_p0, %p245_p13 }
  0x17   : > { %p258_p2 = pneg %p257_p1 }
  0x19   : > { %p265_p7 = pnand %p264_p6, %p258_p2 }
  0x1b   : > { %268 = shalt.err (!%p265_p7)
}
  0x1c   : > { %202 = dma.hbm_to_vmem [thread:$0]  (!%p200_p12), %s453_s0, 128, %s81_s20, [#allocation3]  }
  0x1d   : > { %93 = sbr.rel (%p396_p10) target bundleno = 60 (0x3c), region = 24 }
  0x22   : > { %312 = dma.done.wait (%p207_p9), [#allocation3], 128  }
  0x23   : > { %314 = vsyncadd (%p207_p9), [#allocation3], 4294967168  ;;  %s105_s24 = sand.u32 1, %s325_s7   ;;  %s190_s28 = sshll.u32 %s368_s10, 7  ;;  %v108_v0 = vld [vmem:[#allocation2] sm:$0xff] }
  0x24   : > { %s188_s25 = sshll.u32 %s105_s24, 3  ;;  %s122_s2 = scalar_lea.hbm %s454_s1, %s190_s28 }
  0x25   : > { %s107_s26 = scalar_lea.vmem [#allocation5], %s188_s25  ;;  %s111_s3 = scalar_lea.sflag [#allocation4], %s105_s24 }
  0x26   : > { %s124_s27 = sshll.u32 %s107_s26, 4  ;;  %109 = vst [vmem:[%s107_s26] sm:$0xff] %v108_v0  ;;  %s336_s5 = smov [#allocation5]   ;;  %s415_s27 = int_to_ptr.vmem [resolvable:$true] %s124_s27 }
  0x27   : > { %s269_s4 = scalar_lea.vmem %s415_s27, 128  ;;  %s273_s11 = sshll.u32 %s336_s5, 4  ;;  %s274_s11 = int_to_ptr.vmem [resolvable:$false] %s273_s11 }
  0x28   : > { %p270_p6 = scmp.ne.s32.totalorder %s415_s27, %s269_s4  ;;  %s275_s10 = scalar_lea.vmem %s274_s11, 256 }
  0x29   : > { %p276_p10 = scmp.lt.s32.totalorder %s415_s27, %s274_s11  ;;  %p277_p11 = scmp.lt.s32.totalorder %s275_s10, %s269_s4 }
  0x2a   : > { %p271_p8 = pnand %p270_p6, %p385_p5 }
  0x2b   : > { %p278_p12 = por %p277_p11, %p276_p10 }
  0x2c   : > { %p272_p9 = pneg %p271_p8 }
  0x2e   : > { %p279_p13 = pnand %p278_p12, %p272_p9 }
  0x30   : > { %282 = shalt.err (!%p279_p13)
}
  0x31   : > { %s283_s13 = scalar_lea.hbm %s122_s2, 128  ;;  %s287_s19 = scalar_lea.hbm %s454_s1, 256 }
  0x32   : > { %p284_p0 = scmp.ne.s32.totalorder %s122_s2, %s283_s13  ;;  %p288_p3 = scmp.lt.s32.totalorder %s122_s2, %s454_s1 }
  0x33   : > { %p289_p4 = scmp.lt.s32.totalorder %s287_s19, %s283_s13 }
  0x34   : > { %p285_p1 = pnand %p284_p0, %p385_p5 }
  0x35   : > { %p290_p7 = por %p289_p4, %p288_p3 }
  0x36   : > { %p286_p2 = pneg %p285_p1 }
  0x38   : > { %p291_p6 = pnand %p290_p7, %p286_p2 }
  0x3a   : > { %294 = shalt.err (!%p291_p6)
}
  0x3b   : > { %197 = dma.vmem_to_hbm [thread:$0]  (%p385_p5), %s415_s27, 128, %s122_s2, %s111_s3  }
  0x3c PF: > { %p209_p8 = scmp.ge.s32.totalorder %s333_s9, 2  ;;  %s136_s22 = sand.u32 1, %s321_s6  }
  0x3d   : > { %p458_p9 = scmp.ne.s32.totalorder %s456_s17, 0  ;;  %s137_s23 = scalar_lea.sflag [#allocation4], %s136_s22 }
  0x3f   : > { %p204_p10 = pnand %p209_p8, %p458_p9 }
  0x41   : > { %p205_p11 = pneg %p204_p10 }
  0x43   : > { %316 = dma.done.wait (%p205_p11), %s137_s23, 128  }
  0x44   : > { %318 = vsyncadd (%p205_p11), %s137_s23, 4294967168  ;;  %p12_p12 = scmp.ge.s32.totalorder %s372_s12, 4   ;;  %s459_s6 = smov %s325_s7 }
  0x45   : > { %s460_s7 = smov %s329_s8  ;;  %s461_s8 = smov %s383_s15 }
  0x46   : > { %s462_s9 = smov %s372_s12  ;;  %14 = sbr.rel (!%p12_p12) target bundleno = 4 (0x4), region = 61 }
  0x4b   :  { %142 = vsyncpa [#allocation3], 1 }
  0x4c   :  { %144 = vsyncpa [#allocation3 + $0x1], 1 }
  0x4d   :  { %145 = vsyncpa [#allocation4], 1 }
  0x4e   :  { %147 = vsyncpa [#allocation4 + $0x1], 1 }

// kernel: tpu_custom_call.1
= control target key start
LH: loop header
LB: loop body
LE: loop exit
PB: predicated region body
PF: predicated region fallthrough
CT: control target
= control target key end

     0   :  { %s1746_s0 = inlined_call_operand.vmem [shape: f32[2,8,32], index: 0, kind: input, shape index: {}]   ;;  %s1747_s1 = inlined_call_operand.vmem [shape: f32[4,32,24], index: 1, kind: input, shape index: {}]   ;;  %s1748_s2 = inlined_call_operand.vmem [shape: f32[4,8,32], index: 2, kind: input, shape index: {}]   ;;  %s1749_s3 = inlined_call_operand.vmem [shape: f32[1,32], index: 3, kind: input, shape index: {}]   ;;  %s1750_s4 = inlined_call_operand.vmem [shape: f32[1,32,128], index: 4, kind: input, shape index: {}]   ;;  %s1751_s5 = inlined_call_operand.vmem [shape: f32[1,1,128], index: 5, kind: input, shape index: {}]   ;;  %s1752_s6 = inlined_call_operand.vmem [shape: f32[1,128,32], index: 6, kind: input, shape index: {}]   ;;  %s1753_s7 = inlined_call_operand.vmem [shape: f32[1,32], index: 7, kind: input, shape index: {}]   ;;  %s1754_s8 = inlined_call_operand.vmem [shape: f32[1,32], index: 8, kind: input, shape index: {}]   ;;  %s1755_s9 = inlined_call_operand.vmem [shape: f32[1,32], index: 9, kind: input, shape index: {}]   ;;  %s1756_s10 = inlined_call_operand.vmem [shape: f32[1,32], index: 10, kind: input, shape index: {}]   ;;  %s1757_s11 = inlined_call_operand.vmem [shape: f32[1,32], index: 11, kind: input, shape index: {}]   ;;  %s1758_s12 = inlined_call_operand.hbm [shape: f32[2,8,32], index: 12, kind: output, shape index: {}]  }
   0x1   :  { %1760 = sst [smem:[#allocation11_spill]] %s1746_s0 }
   0x2   :  { %1761 = sst [smem:[#allocation12_spill]] %s1747_s1 }
   0x3   :  { %1762 = sst [smem:[#allocation13_spill]] %s1748_s2 }
   0x4   :  { %1763 = sst [smem:[#allocation14_spill]] %s1749_s3 }
   0x5   :  { %17 = vsyncpa [#allocation9], 0 }
   0x6   :  { %19 = vsyncpa [#allocation9 + $0x1], 0  ;;  %s1480_s21 = smov 0   ;;  %s1482_s22 = smov 0  }
   0x7   :  { %s1484_s23 = smov 0   ;;  %s1486_s24 = smov 0  }
   0x8 LB: > { %s1501_s25 = sadd.s32 4294967295, %s1400_s24   ;;  %s1137_s26 = sadd.s32 4294967294, %s1400_s24   ;;  %s1400_s24 = sphi %s1486_s24, %s1776_s24   ;;  %s1396_s23 = sphi %s1484_s23, %s1775_s23   ;;  %s1392_s22 = sphi %s1482_s22, %s1774_s22   ;;  %s1388_s21 = sphi %s1480_s21, %s1773_s21  }
   0x9   : > { %s1505_s27 = sadd.s32 1, %s1400_s24   ;;  %s289_s28 = sadd.s32 1, %s1396_s23 }
   0xa   : > { %s286_s29 = ssub.s32 %s1400_s24, %s1505_s27  ;;  %p299_p0 = scmp.ne.s32.totalorder %s1396_s23, %s1392_s22 }
   0xb   : > { %p287_p1 = scmp.eq.s32.totalorder %s286_s29, 0  ;;  %p300_p2 = scmp.eq.s32.totalorder %s1501_s25, 1 }
   0xc   : > { %p305_p3 = scmp.ne.s32.totalorder %s1392_s22, %s1388_s21  ;;  %p306_p4 = scmp.eq.s32.totalorder %s1137_s26, 1 }
   0xd   : > { %s1516_s30 = scalar_select %p287_p1, %s1396_s23, %s289_s28  }
   0xe   : > { %p1518_p5 = por %p300_p2, %p299_p0  ;;  %p1522_p6 = por %p306_p4, %p305_p3 }
   0xf   : > { %p1140_p7 = scmp.ge.s32.totalorder %s1400_s24, 1  ;;  %p364_p8 = scmp.lt.s32.totalorder %s1400_s24, 3 }
  0x11   : > { %p365_p9 = pnand %p1140_p7, %p364_p8 }
  0x12   : > { %p405_p10 = scmp.lt.s32.totalorder (!%p365_p9), %s1501_s25, 1  ;;  %s1766_s0 = sld [smem:[#allocation11_spill]] (!%p365_p9) }
  0x13   : > { %368 = sbr.rel (%p365_p9) target bundleno = 2394 (0x95a), region = 68  ;;  %s1759_s20 = sand.u32 (!%p365_p9), 1, %s1392_s22  }
  0x14   : > { %s1544_s26 = sshll.u32 (!%p365_p9), %s1759_s20, 3  ;;  %s1558_s18 = smov (!%p365_p9), 0  }
  0x18   : > { %vm412_vm0 = vcmask 261120   ;;  %v1406_v0 = vmov 0.0   ;;  %s406_s15 = scalar_select %p405_p10, %s1501_s25, 1  ;;  %v441_v8 = vlaneseq  ;;  %v1143_v14 = vld [vmem:[%s1754_s8] ss:$0 sm:$0xff] }
  0x19   : > { %443 = vst.msk [vmem:[#allocation2] sm:$0xff] %vm412_vm0, %v1406_v0  ;;  %v1144_v16 = vld [vmem:[%s1755_s9] ss:$0 sm:$0xff] }
  0x1a   : > { %s1142_s16 = sshll.u32 %s406_s15, 3  ;;  %v1547_v9 = vshrl.u32 %v441_v8, 7 }
  0x1b   : > { %s408_s19 = scalar_lea.vmem %s1766_s0, %s1142_s16 }
  0x1c   : > { %v1535_v1 = vld [vmem:[%s408_s19] sm:$0xff] }
  0x1d   : > { %v413_v2 = vsel %vm412_vm0, %v1535_v1, 0.0 }
  0x1e   : > { %414 = vadd.xlane.f32.xlu0 %v413_v2 }
  0xa7   : > { %v415_v3 = vpop.xlane.xlu0 %414 }
  0xa8   : > { %v417_v4 = vmul.f32 0.03125, %v415_v3 }
  0xaa   : > { %v418_v5 = vsub.f32 %v1535_v1, %v417_v4 }
  0xac   : > { %v419_v6 = vmul.f32 %v418_v5, %v418_v5 }
  0xae   : > { %v420_v7 = vsel %vm412_vm0, %v419_v6, 0.0 }
  0xaf   : > { %421 = vadd.xlane.f32.xlu0 %v420_v7 }
 0x138   : > { %v422_v10 = vpop.xlane.xlu0 %421 }
 0x139   : > { %v423_v11 = vmul.f32 0.03125, %v422_v10 }
 0x13b   : > { %v424_v12 = vadd.f32 1e-05, %v423_v11 }
 0x13d   : > { %1322 = vrsqrt.f32 %v424_v12 }
 0x14a   : > { %v1323_v13 = vpop.eup %1322 }
 0x14b   : > { %v426_v15 = vmul.f32 %v1323_v13, %v418_v5 }
 0x14d   : > { %v433_v17 = vmul.f32 %v1143_v14, %v426_v15 }
 0x14f   : > { %v1555_v18 = vadd.f32 %v1144_v16, %v433_v17 }
 0x150 LB: >> { %v1407_v19 = vmov 0.0   ;;  %vm1408_vm1 = vmmov 0   ;;  %s1145_s19 = sshll.u32 %s1404_s18, 5  ;;  %s1767_s1 = sld [smem:[#allocation12_spill]]  ;;  %vm534_vm2 = vcmask 64512   ;;  %vm540_vm3 = vcmask 7168   ;;  %s1404_s18 = sphi %s1558_s18, %s449_s18  }
 0x151   : >> { %1195 = vmatprep.subr.mxu0 %v1407_v19  ;;  %1203 = vmatprep.mubr.msk.f32.mxu0 %vm1408_vm1, %v1407_v19  ;;  %543 = vst.msk [vmem:[#allocation3] sm:$0xff] %vm534_vm2, %v1407_v19  ;;  %s1409_s16 = smov 120   ;;  %v1410_v29 = vmov -1e+30   ;;  %v623_v30 = vand.u32 127, %v441_v8  ;;  %v1411_v35 = vmov 0  }
 0x152   : >> { %1206 = vmatprep.subr.mxu1 %v1407_v19  ;;  %1208 = vmatprep.mubr.msk.f32.mxu1 %vm1408_vm1, %v1407_v19  ;;  %541 = vst.msk [vmem:[#allocation4] sm:$0xff] %vm540_vm3, %v1410_v29  ;;  %542 = vst.msk [vmem:[#allocation5] sm:$0xff] %vm540_vm3, %v1407_v19  ;;  %s1150_s28 = sshll.u32 %s1404_s18, 3  ;;  %s1768_s2 = sld [smem:[#allocation13_spill]]  ;;  %v743_v3 = vld [vmem:[#allocation2] sm:$0xff] }
 0x153   : >> { %vm626_vm4 = vcmp.gt.s32.totalorder %v623_v30, %v1547_v9  ;;  %1324 = vset.pattern.permute.xlu1 %v1411_v35  ;;  %1325 = vset.pattern.permute.xlu0 %v1411_v35  ;;  %s449_s18 = sadd.s32 1, %s1404_s18  }
 0x154   : >> { %p446_p11 = scmp.ge.s32.totalorder %s449_s18, 4  }
 0x155   : > { %s1769_s3 = sld [smem:[#allocation14_spill]] (%p446_p11)  ;;  %v865_v17 = vld [vmem:[%s1750_s4 + $0x18] sm:$0xff] (%p446_p11)  ;;  %vm1413_vm5 = vmmov (%p446_p11), 0   ;;  %v970_v30 = vld [vmem:[%s1752_s6 + $0x70] sm:$0xff] (%p446_p11)  ;;  %v965_v35 = vld [vmem:[%s1752_s6 + $0x48] sm:$0xff] (%p446_p11) }
 0x156   : >> { %s451_s15 = scalar_lea.vmem %s1767_s1, %s1145_s19  ;;  %s1412_s19 = smov 112   ;;  %v971_v29 = vld [vmem:[%s1752_s6 + $0x78] sm:$0xff] (%p446_p11) }
 0x157   : >> { %v455_v20 = vld [vmem:[%s451_s15 + $0x18] sm:$0xff]  ;;  %v454_v21 = vld [vmem:[%s451_s15 + $0x10] sm:$0xff]  ;;  %v453_v22 = vld [vmem:[%s451_s15 + $0x8] sm:$0xff]  ;;  %s1772_s1 = sand.u32 (%p446_p11), 1, %s1392_s22  }
 0x158   : >> { %1196 = vmatpush3.msra.mxu0 %v455_v20  ;;  %v452_v23 = vld [vmem:[%s451_s15] sm:$0xff]  ;;  %v651_v56 = vld [vmem:[#allocation3] sm:$0xff]  ;;  %s1159_s15 = sshll.u32 (%p446_p11), %s1501_s25, 7  ;;  %s1414_s25 = smov (%p446_p11), [#allocation8]  }
 0x159   : >> { %1197 = vmatprep.subr.mxu0 %v1407_v19  ;;  %v628_v36 = vld [vmem:[#allocation4] sm:$0xff]  ;;  %v644_v50 = vld [vmem:[#allocation5] sm:$0xff]  ;;  %s1067_s20 = scalar_lea.hbm (%p446_p11), %s1758_s12, %s1159_s15  ;;  %s1340_s17 = sshll.u32 (%p446_p11), %s1414_s25, 4  ;;  %s1341_s17 = int_to_ptr.vmem [resolvable:$false] %s1340_s17 }
 0x15a   : >> { %1198 = vmatpush3.msra.mxu0 %v454_v21  ;;  %s1342_s29 = scalar_lea.vmem (%p446_p11), %s1341_s17, 256 }
 0x15b   : >> { %1199 = vmatprep.subr.mxu0 %v1407_v19  ;;  %v1152_v10 = vld [vmem:[%s1769_s3] ss:$0 sm:$0xff] (%p446_p11) }
 0x15c   : >> { %1200 = vmatpush3.msra.mxu0 %v453_v22 }
 0x15d   : >> { %1201 = vmatprep.subr.mxu0 %v1407_v19 }
 0x15e   : >> { %1202 = vmatpush3.msra.mxu0 %v452_v23 }
 0x15f   : >> { %1204 = vmatmul.mubr.msk.f32.vlgmr.msra.gmra.mxu0 %vm412_vm0, %v1555_v18  ;;  %1216 = vmatprep.subr.mxu0 %v1407_v19  ;;  %v863_v18 = vld [vmem:[%s1750_s4 + $0x8] sm:$0xff] (%p446_p11) }
 0x160   : >> { %1218 = vmatprep.mubr.msk.f32.mxu0 %vm1408_vm1, %v1407_v19 }
 0x21f   : >> { %v525_v24 = vpop.f32.mrf.mxu0 }
 0x220   : >> { %531 = vrot.lane.b32.xlu0 %v525_v24, %s1409_s16  ;;  %v529_v28 = vmul.f32 0.35355338, %v525_v24  ;;  %s745_s16 = scalar_lea.vmem %s1768_s2, %s1150_s28  ;;  %s1056_s2 = scalar_lea.sflag (%p446_p11), [#allocation9], %s1772_s1 }
 0x221   : >> { %v1205_v25 = vpop.f32.mrf.mxu0  ;;  %v746_v49 = vld [vmem:[%s745_s16] sm:$0xff]  ;;  %s1770_s16 = scalar_lea.vmem (%p446_p11), [#allocation8], %s1544_s26 }
 0x222   : >> { %1217 = vmatpush3.msra.mxu0 %v746_v49  ;;  %s1771_s0 = smov (%p446_p11), %s1770_s16 }
 0x223   : > { %1221 = vmatprep.subr.mxu0 (%p446_p11), %v1406_v0 }
 0x292   : >> { %v532_v26 = vpop.permute.xlu0 %531 }
 0x293   : >> { %535 = vst.msk [vmem:[#allocation6] sm:$0xff] %vm534_vm2, %v532_v26  ;;  %v1154_v26 = vld [vmem:[%s1757_s11] ss:$0 sm:$0xff] (%p446_p11) }
 0x29a   : >> { %v544_v27 = vld [vmem:[#allocation6] sm:$0xff] }
 0x29b   : >> { %1207 = vmatpush3.xpose.msk.msra.mxu1 %vm534_vm2, %v544_v27 }
 0x29c   : >> { %1211 = vmatprep.subr.mxu1 %v1407_v19 }
 0x29e   : >> { %1209 = vmatmul.mubr.msk.f32.vlgmr.msra.gmra.mxu1 %vm534_vm2, %v529_v28 }
 0x29f   : >> { %1213 = vmatprep.mubr.msk.f32.mxu1 %vm1408_vm1, %v1407_v19  ;;  %v862_v19 = vld [vmem:[%s1750_s4] sm:$0xff] (%p446_p11) }
 0x35e   : >> { %v618_v31 = vpop.f32.mrf.mxu1 }
 0x35f   : >> { %v627_v32 = vsel %vm626_vm4, -1e+30, %v618_v31  ;;  %v969_v31 = vld [vmem:[%s1752_s6 + $0x68] sm:$0xff] (%p446_p11) }
 0x360   : >> { %v1210_v33 = vpop.f32.mrf.mxu1  ;;  %v629_v34 = vsel %vm534_vm2, %v627_v32, -inf }
 0x361   : >> { %630 = vmax.xlane.f32.xlu0 %v629_v34  ;;  %v967_v33 = vld [vmem:[%s1752_s6 + $0x58] sm:$0xff] (%p446_p11)  ;;  %v966_v34 = vld [vmem:[%s1752_s6 + $0x50] sm:$0xff] (%p446_p11) }
 0x3ea   : >> { %v631_v37 = vpop.xlane.xlu0 %630 }
 0x3eb   : >> { %v632_v38 = vmax.f32 %v628_v36, %v631_v37  ;;  %v963_v37 = vld [vmem:[%s1752_s6 + $0x38] sm:$0xff] (%p446_p11) }
 0x3ed   : >> { %v633_v39 = vsub.f32 %v628_v36, %v632_v38  ;;  %733 = vst.msk [vmem:[#allocation4] sm:$0xff] %vm540_vm3, %v632_v38  ;;  %638 = vperm.xlu1 %1324, %v632_v38   ;;  %v964_v36 = vld [vmem:[%s1752_s6 + $0x40] sm:$0xff] (%p446_p11)  ;;  %v962_v38 = vld [vmem:[%s1752_s6 + $0x30] sm:$0xff] (%p446_p11) }
 0x3ef   : >> { %v634_v40 = vmul.f32 1.442695, %v633_v39  ;;  %v961_v39 = vld [vmem:[%s1752_s6 + $0x28] sm:$0xff] (%p446_p11) }
 0x3f1   : >> { %1326 = vpow2.f32 %v634_v40  ;;  %536 = vrot.lane.b32.xlu1 %v525_v24, %s1412_s19  ;;  %v1153_v24 = vld [vmem:[%s1756_s10] ss:$0 sm:$0xff] (%p446_p11)  ;;  %s1069_s19 = sshll.u32 (%p446_p11), %s1770_s16, 4  ;;  %s1070_s19 = int_to_ptr.vmem [resolvable:$true] %s1069_s19 }
 0x3f2   : > { %v960_v40 = vld [vmem:[%s1752_s6 + $0x20] sm:$0xff] (%p446_p11)  ;;  %s1336_s3 = scalar_lea.vmem (%p446_p11), %s1070_s19, 128  ;;  %p1343_p1 = scmp.lt.s32.totalorder (%p446_p11), %s1070_s19, %s1341_s17 }
 0x3f3   : > { %p1337_p12 = scmp.ne.s32.totalorder (%p446_p11), %s1070_s19, %s1336_s3  ;;  %p1344_p2 = scmp.lt.s32.totalorder (%p446_p11), %s1342_s29, %s1336_s3 }
 0x3f5   : > { %p1338_p13 = pnand (%p446_p11), %p1337_p12, %p1518_p5  ;;  %p1345_p3 = por (%p446_p11), %p1344_p2, %p1343_p1 }
 0x3f7   : > { %p1339_p0 = pneg (%p446_p11), %p1338_p13 }
 0x3f9   : > { %p1346_p4 = pnand (%p446_p11), %p1345_p3, %p1339_p0 }
 0x3fe   : >> { %v1327_v41 = vpop.eup %1326 }
 0x3ff   : >> { %654 = vperm.xlu0 %1325, %v1327_v41   ;;  %v645_v51 = vmul.f32 %v1327_v41, %v644_v50  ;;  %v959_v41 = vld [vmem:[%s1752_s6 + $0x18] sm:$0xff] (%p446_p11) }
 0x468   : >> { %v639_v42 = vpop.permute.xlu1 %638 }
 0x469   : >> { %v641_v43 = vsub.f32 %v627_v32, %v639_v42  ;;  %v968_v32 = vld [vmem:[%s1752_s6 + $0x60] sm:$0xff] (%p446_p11)  ;;  %v958_v42 = vld [vmem:[%s1752_s6 + $0x10] sm:$0xff] (%p446_p11) }
 0x46b   : >> { %v642_v44 = vmul.f32 1.442695, %v641_v43  ;;  %v957_v43 = vld [vmem:[%s1752_s6 + $0x8] sm:$0xff] (%p446_p11) }
 0x46c   : >> { %v537_v45 = vpop.permute.xlu1 %536 }
 0x46d   : >> { %1328 = vpow2.f32 %v642_v44  ;;  %539 = vst.msk [vmem:[#allocation7] sm:$0xff] %vm534_vm2, %v537_v45  ;;  %v956_v44 = vld [vmem:[%s1752_s6] sm:$0xff] (%p446_p11) }
 0x46e   : > { %v1155_v45 = vld [vmem:[%s1751_s5] ss:$0 sm:$0xff] (%p446_p11) }
 0x474   : >> { %v545_v46 = vld [vmem:[#allocation7] sm:$0xff] }
 0x475   : >> { %1212 = vmatpush3.msra.mxu1 %v545_v46 }
 0x476   : > { %1232 = vmatprep.subr.mxu1 (%p446_p11), %v1406_v0 }
 0x47a   : >> { %v1329_v47 = vpop.eup %1328  ;;  %v655_v57 = vpop.permute.xlu0 %654 }
 0x47b   : >> { %1214 = vmatmul.mubr.msk.f32.vlgmr.msra.gmra.mxu1 %vm534_vm2, %v1329_v47  ;;  %v646_v48 = vsel %vm534_vm2, %v1329_v47, 0.0  ;;  %v657_v58 = vmul.f32 %v655_v57, %v651_v56 }
 0x47c   : >> { %647 = vadd.xlane.f32.xlu1 %v646_v48  ;;  %1264 = vmatprep.mubr.msk.f32.mxu1 (%p446_p11), %vm1413_vm5, %v1406_v0 }
 0x47d   : > { %1233 = vmatpush3.msra.mxu1 (%p446_p11), %v971_v29 }
 0x47e   : > { %1234 = vmatprep.subr.mxu1 (%p446_p11), %v1406_v0 }
 0x47f   : > { %1235 = vmatpush3.msra.mxu1 (%p446_p11), %v970_v30 }
 0x480   : > { %1236 = vmatprep.subr.mxu1 (%p446_p11), %v1406_v0 }
 0x481   : > { %1237 = vmatpush3.msra.mxu1 (%p446_p11), %v969_v31 }
 0x482   : > { %1238 = vmatprep.subr.mxu1 (%p446_p11), %v1406_v0 }
 0x483   : > { %1239 = vmatpush3.msra.mxu1 (%p446_p11), %v968_v32 }
 0x484   : > { %1240 = vmatprep.subr.mxu1 (%p446_p11), %v1406_v0 }
 0x485   : > { %1241 = vmatpush3.msra.mxu1 (%p446_p11), %v967_v33 }
 0x486   : > { %1242 = vmatprep.subr.mxu1 (%p446_p11), %v1406_v0 }
 0x487   : > { %1243 = vmatpush3.msra.mxu1 (%p446_p11), %v966_v34 }
 0x488   : > { %1244 = vmatprep.subr.mxu1 (%p446_p11), %v1406_v0 }
 0x489   : > { %1245 = vmatpush3.msra.mxu1 (%p446_p11), %v965_v35 }
 0x48a   : > { %1246 = vmatprep.subr.mxu1 (%p446_p11), %v1406_v0 }
 0x48b   : > { %1247 = vmatpush3.msra.mxu1 (%p446_p11), %v964_v36 }
 0x48c   : > { %1248 = vmatprep.subr.mxu1 (%p446_p11), %v1406_v0 }
 0x48d   : > { %1249 = vmatpush3.msra.mxu1 (%p446_p11), %v963_v37 }
 0x48e   : > { %1250 = vmatprep.subr.mxu1 (%p446_p11), %v1406_v0 }
 0x48f   : > { %1251 = vmatpush3.msra.mxu1 (%p446_p11), %v962_v38 }
 0x490   : > { %1252 = vmatprep.subr.mxu1 (%p446_p11), %v1406_v0 }
 0x491   : > { %1253 = vmatpush3.msra.mxu1 (%p446_p11), %v961_v39 }
 0x492   : > { %1254 = vmatprep.subr.mxu1 (%p446_p11), %v1406_v0 }
 0x493   : > { %1255 = vmatpush3.msra.mxu1 (%p446_p11), %v960_v40 }
 0x494   : > { %1256 = vmatprep.subr.mxu1 (%p446_p11), %v1406_v0 }
 0x495   : > { %1257 = vmatpush3.msra.mxu1 (%p446_p11), %v959_v41 }
 0x496   : > { %1258 = vmatprep.subr.mxu1 (%p446_p11), %v1406_v0 }
 0x497   : > { %1259 = vmatpush3.msra.mxu1 (%p446_p11), %v958_v42 }
 0x498   : > { %1260 = vmatprep.subr.mxu1 (%p446_p11), %v1406_v0 }
 0x499   : > { %1261 = vmatpush3.msra.mxu1 (%p446_p11), %v957_v43 }
 0x49a   : > { %1262 = vmatprep.subr.mxu1 (%p446_p11), %v1406_v0 }
 0x49b   : > { %1263 = vmatpush3.msra.mxu1 (%p446_p11), %v956_v44 }
 0x505   : >> { %v648_v52 = vpop.xlane.xlu1 %647 }
 0x506   : >> { %v649_v53 = vadd.f32 %v648_v52, %v645_v51 }
 0x508   : >> { %650 = vst.msk [vmem:[#allocation5] sm:$0xff] %vm540_vm3, %v649_v53 }
 0x50f   : >> { %v735_v54 = vld [vmem:[#allocation5] sm:$0xff] }
 0x510   : >> { %1330 = vrcp.f32 %v735_v54 }
 0x51d   : >> { %v1331_v55 = vpop.eup %1330 }
 0x51e   : >> { %739 = vperm.xlu1 %1324, %v1331_v55  }
 0x53b   : >> { %v727_v59 = vpop.f32.mrf.mxu1 }
 0x53c   : >> { %v731_v60 = vadd.f32 %v727_v59, %v657_v58 }
 0x53d   : >> { %v1215_v61 = vpop.f32.mrf.mxu1 }
 0x53e   : >> { %732 = vst.msk [vmem:[#allocation3] sm:$0xff] %vm534_vm2, %v731_v60  ;;  %v1157_v61 = vld [vmem:[%s1753_s7] ss:$0 sm:$0xff] (%p446_p11) }
 0x545   : >> { %v734_v63 = vld [vmem:[#allocation3] sm:$0xff] }
 0x599   : >> { %v740_v62 = vpop.permute.xlu1 %739 }
 0x59a   : >> { %v742_v2 = vmul.f32 %v740_v62, %v734_v63 }
 0x59c   : >> { %1219 = vmatmul.mubr.msk.f32.vlgmr.msra.gmra.mxu0 %vm534_vm2, %v742_v2 }
 0x59d   : > { %1222 = vmatpush3.msra.mxu0 (%p446_p11), %v865_v17  ;;  %1229 = vmatprep.mubr.msk.f32.mxu0 (%p446_p11), %vm1413_vm5, %v1406_v0 }
 0x59e   : > { %1223 = vmatprep.subr.mxu0 (%p446_p11), %v1406_v0 }
 0x65b   : > { %448 = sbr.rel (!%p446_p11) target bundleno = 336 (0x150), region = 112 }
 0x65c   : >> { %v816_v4 = vpop.f32.mrf.mxu0 }
 0x65d   : >> { %v820_v5 = vadd.f32 %v816_v4, %v743_v3 }
 0x65e   : >> { %v1220_v6 = vpop.f32.mrf.mxu0 }
 0x65f   : >> { %821 = vst.msk [vmem:[#allocation2] sm:$0xff] %vm412_vm0, %v820_v5 }
 0x666   : > { %v822_v7 = vld [vmem:[#allocation2] sm:$0xff] }
 0x667   : > { %v830_v11 = vadd.f32 %v1152_v10, %v822_v7  ;;  %861 = vst.msk [vmem:[#allocation2] sm:$0xff] %vm412_vm0, %v1406_v0 }
 0x669   : > { %v1605_v12 = vadd.f32 %v830_v11, %v1535_v1  ;;  %v864_v1 = vld [vmem:[%s1750_s4 + $0x10] sm:$0xff] }
 0x66a   : > { %1224 = vmatpush3.msra.mxu0 %v864_v1 }
 0x66b   : > { %v834_v13 = vsel %vm412_vm0, %v1605_v12, 0.0  ;;  %1225 = vmatprep.subr.mxu0 %v1406_v0 }
 0x66c   : > { %835 = vadd.xlane.f32.xlu0 %v834_v13  ;;  %1226 = vmatpush3.msra.mxu0 %v863_v18 }
 0x66d   : > { %1227 = vmatprep.subr.mxu0 %v1406_v0 }
 0x66e   : > { %1228 = vmatpush3.msra.mxu0 %v862_v19  ;;  %v955_v57 = vld [vmem:[#allocation2] sm:$0xff] }
 0x6f5   : > { %v836_v8 = vpop.xlane.xlu0 %835 }
 0x6f6   : > { %v837_v9 = vmul.f32 0.03125, %v836_v8 }
 0x6f8   : > { %v838_v14 = vsub.f32 %v1605_v12, %v837_v9 }
 0x6fa   : > { %v839_v15 = vmul.f32 %v838_v14, %v838_v14 }
 0x6fc   : > { %v840_v16 = vsel %vm412_vm0, %v839_v15, 0.0 }
 0x6fd   : > { %841 = vadd.xlane.f32.xlu0 %v840_v16 }
 0x786   : > { %v842_v20 = vpop.xlane.xlu0 %841 }
 0x787   : > { %v843_v21 = vmul.f32 0.03125, %v842_v20 }
 0x789   : > { %v844_v22 = vadd.f32 1e-05, %v843_v21 }
 0x78b   : > { %1332 = vrsqrt.f32 %v844_v22 }
 0x798   : > { %v1333_v23 = vpop.eup %1332 }
 0x799   : > { %v846_v25 = vmul.f32 %v1333_v23, %v838_v14 }
 0x79b   : > { %v853_v27 = vmul.f32 %v1153_v24, %v846_v25 }
 0x79d   : > { %v860_v28 = vadd.f32 %v1154_v26, %v853_v27 }
 0x79f   : > { %1230 = vmatmul.mubr.msk.f32.vlgmr.msra.gmra.mxu0 %vm412_vm0, %v860_v28 }
 0x85f   : > { %v942_v46 = vpop.f32.mrf.mxu0 }
 0x860   : > { %v943_v47 = vadd.f32 %v1155_v45, %v942_v46 }
 0x861   : > { %v1231_v48 = vpop.f32.mrf.mxu0 }
 0x862   : > { %v947_v49 = vmul.f32 %v943_v47, %v943_v47  ;;  %v946_v55 = vmul.f32 0.5, %v943_v47 }
 0x864   : > { %v948_v50 = vmul.f32 %v947_v49, %v943_v47 }
 0x866   : > { %v949_v51 = vmul.f32 0.044715, %v948_v50 }
 0x868   : > { %v950_v52 = vadd.f32 %v949_v51, %v943_v47 }
 0x86a   : > { %v951_v53 = vmul.f32 0.7978845, %v950_v52 }
 0x86c   : > { %1334 = vtanh.f32 %v951_v53 }
 0x879   : > { %v1335_v54 = vpop.eup %1334 }
 0x87a   : > { %v953_v56 = vadd.f32 1.0, %v1335_v54 }
 0x87c   : > { %v954_v0 = vmul.f32 %v953_v56, %v946_v55 }
 0x87e   : > { %1265 = vmatmul.mubr.f32.vlgmr.msra.gmra.mxu1 %v954_v0 }
 0x93e   : > { %v1038_v58 = vpop.f32.mrf.mxu1 }
 0x93f   : > { %v1042_v59 = vadd.f32 %v1038_v58, %v955_v57 }
 0x940   : > { %v1266_v60 = vpop.f32.mrf.mxu1 }
 0x941   : > { %1043 = vst.msk [vmem:[#allocation2] sm:$0xff] %vm412_vm0, %v1042_v59 }
 0x948   : > { %v1044_v62 = vld [vmem:[#allocation2] sm:$0xff] }
 0x949   : > { %v1052_v63 = vadd.f32 %v1157_v61, %v1044_v62 }
 0x94b   : > { %v1053_v2 = vadd.f32 %v1052_v63, %v1605_v12 }
 0x94d   : > { %1054 = vst.msk [vmem:[%s1771_s0] sm:$0xff] %vm412_vm0, %v1053_v2 }
 0x94e   : > { %1349 = shalt.err (!%p1346_p4)
}
 0x94f   : > { %s1350_s15 = scalar_lea.hbm %s1067_s20, 128  ;;  %s1354_s26 = scalar_lea.hbm %s1758_s12, 256 }
 0x950   : > { %p1351_p7 = scmp.ne.s32.totalorder %s1067_s20, %s1350_s15  ;;  %p1355_p10 = scmp.lt.s32.totalorder %s1067_s20, %s1758_s12 }
 0x951   : > { %p1356_p11 = scmp.lt.s32.totalorder %s1354_s26, %s1350_s15 }
 0x952   : > { %p1352_p8 = pnand %p1351_p7, %p1518_p5 }
 0x953   : > { %p1357_p12 = por %p1356_p11, %p1355_p10 }
 0x954   : > { %p1353_p9 = pneg %p1352_p8 }
 0x956   : > { %p1358_p13 = pnand %p1357_p12, %p1353_p9 }
 0x958   : > { %1361 = shalt.err (!%p1358_p13)
}
 0x959   : > { %1267 = dma.vmem_to_hbm [thread:$0]  (%p1518_p5), %s1070_s19, 128, %s1067_s20, %s1056_s2  }
 0x95a PF: > { %p1273_p0 = scmp.ge.s32.totalorder %s1400_s24, 2  ;;  %s1081_s3 = sand.u32 1, %s1388_s21  }
 0x95b   : > { %s1082_s18 = scalar_lea.sflag [#allocation9], %s1081_s3 }
 0x95c   : > { %p1270_p1 = pnand %p1273_p0, %p1522_p6 }
 0x95e   : > { %p1271_p2 = pneg %p1270_p1 }
 0x960   : > { %1383 = dma.done.wait (%p1271_p2), %s1082_s18, 128  }
 0x961   : > { %1385 = vsyncadd (%p1271_p2), %s1082_s18, 4294967168  ;;  %p22_p3 = scmp.ge.s32.totalorder %s1505_s27, 4   ;;  %s1773_s21 = smov %s1392_s22 }
 0x962   : > { %s1774_s22 = smov %s1396_s23  ;;  %s1775_s23 = smov %s1516_s30 }
 0x963   : > { %s1776_s24 = smov %s1505_s27  ;;  %24 = sbr.rel (!%p22_p3) target bundleno = 8 (0x8), region = 123 }
 0x968   :  { %1087 = vsyncpa [#allocation9], 1 }
 0x969   :  { %1089 = vsyncpa [#allocation9 + $0x1], 1 }

</bundles_post_ra>
